<compile_context>
chip_gen: v7x
topology: tpu7x:2x2x1
jax: 0.10.0
libtpu: 0.0.40
codegen_flags: <defaults>
</compile_context>

<pallas_src>
import jax
import jax.numpy as jnp
from jax.experimental import pallas as pl
from jax.experimental.pallas import tpu as pltpu

# Explicit scoped-VMEM request (<= default on all of v5e/v6e/v7x; tiles below
# are sized to fit comfortably even with double buffering on v7x's 64 MiB).
_VMEM_LIMIT = 32 * 1024 * 1024


# ----------------------------- Pallas kernels ------------------------------ #

def _conv_stats_kernel(a_ref, w_ref, y_ref, sum_ref, sq_ref, acc_ref):
    """One (tile_m, Cp) tile of y = A @ W, reduced over the KKC grid axis.

    a_ref:   (tile_m, tile_k)  bf16 im2col patch tile
    w_ref:   (tile_k, Cp)      bf16 weight tile (Cout lane-padded to Cp)
    y_ref:   (tile_m, Cp)      f32 conv output tile
    sum_ref: (1, 1, Cp)        per-tile channel sums      (BN partials)
    sq_ref:  (1, 1, Cp)        per-tile channel sum-of-squares
    acc_ref: (tile_m, Cp)      f32 VMEM accumulator scratch
    """
    k = pl.program_id(1)

    @pl.when(k == 0)
    def _():
        acc_ref[...] = jnp.zeros_like(acc_ref)

    acc_ref[...] += jnp.dot(a_ref[...], w_ref[...],
                            preferred_element_type=jnp.float32)

    @pl.when(k == pl.num_programs(1) - 1)
    def _():
        acc = acc_ref[...]
        y_ref[...] = acc
        # BN partial stats fused into the matmul epilogue (XLU-slot reductions),
        # so the stats phase never re-reads y from HBM.
        sum_ref[...] = jnp.sum(acc, axis=0, keepdims=True).reshape(sum_ref.shape)
        sq_ref[...] = jnp.sum(acc * acc, axis=0, keepdims=True).reshape(sq_ref.shape)


def _bn_relu_kernel(y_ref, scale_ref, shift_ref, o_ref):
    # Pure VPU elementwise: y * scale + shift, then ReLU.
    # scale/shift are precomputed (1, Cp) per-channel vectors.
    o_ref[...] = jnp.maximum(y_ref[...] * scale_ref[...] + shift_ref[...], 0.0)


# ------------------------------ Python wrapper ------------------------------ #

def conv_bn_relu(x_nchw, weight_oihw, gamma, beta, *, kernel_size=3,
                 eps=1e-5, tile_m=256):
    """Forward of ConvBNReLU (training-mode BN batch statistics)."""
    N, Cin, H, W = x_nchw.shape
    Cout = weight_oihw.shape[0]
    K = kernel_size
    pad = (K - 1) // 2                       # dilation=1 -> "same" padding

    M = N * H * W
    KKC = K * K * Cin
    Cp = pl.cdiv(Cout, 128) * 128            # lane-dense output channels
    tile_m = min(tile_m, M)                  # production M: use 512-1024 (VMEM permitting)
    M_pad = pl.cdiv(M, tile_m) * tile_m
    tile_k = KKC                             # KKC=36 fits in one K step here; large Cin
    num_m = M_pad // tile_m                  # would use 256-512-wide K tiles on this axis.
    num_k = KKC // tile_k

    # ---- glue (plain JAX): NCHW -> NHWC (bf16), pad, im2col ----
    # TODO(synk): for production shapes, eliminate this HBM im2col slab entirely
    # (halo-tiled tap reduction with manual DMA of the padded NHWC input).
    x = jnp.transpose(x_nchw, (0, 2, 3, 1)).astype(jnp.bfloat16)
    xp = jnp.pad(x, ((0, 0), (pad, pad), (pad, pad), (0, 0)))
    cols = [xp[:, kh:kh + H, kw:kw + W, :] for kh in range(K) for kw in range(K)]
    patches = jnp.stack(cols, axis=3).reshape(M, KKC)
    if M_pad != M:
        # Zero rows: zero conv output -> contribute 0 to the BN sums; sliced off later.
        patches = jnp.pad(patches, ((0, M_pad - M), (0, 0)))

    w_mat = jnp.transpose(weight_oihw, (2, 3, 1, 0)).reshape(KKC, Cout)
    w_mat = jnp.pad(w_mat, ((0, 0), (0, Cp - Cout))).astype(jnp.bfloat16)

    # ---- Pallas kernel 1: tiled bf16 matmul (f32 acc) + fused BN partial sums ----
    y, tile_sum, tile_sq = pl.pallas_call(
        _conv_stats_kernel,
        out_shape=[
            jax.ShapeDtypeStruct((M_pad, Cp), jnp.float32),
            jax.ShapeDtypeStruct((num_m, 1, Cp), jnp.float32),
            jax.ShapeDtypeStruct((num_m, 1, Cp), jnp.float32),
        ],
        grid=(num_m, num_k),
        in_specs=[
            pl.BlockSpec((tile_m, tile_k), lambda i, k: (i, k)),
            pl.BlockSpec((tile_k, Cp), lambda i, k: (k, 0)),
        ],
        out_specs=[
            pl.BlockSpec((tile_m, Cp), lambda i, k: (i, 0)),
            pl.BlockSpec((1, 1, Cp), lambda i, k: (i, 0, 0)),
            pl.BlockSpec((1, 1, Cp), lambda i, k: (i, 0, 0)),
        ],
        scratch_shapes=[pltpu.VMEM((tile_m, Cp), jnp.float32)],
        compiler_params=pltpu.CompilerParams(
            dimension_semantics=("parallel", "arbitrary"),
            vmem_limit_bytes=_VMEM_LIMIT),
    )(patches, w_mat)

    # ---- finalize BN batch stats on tiny (Cp,) vectors (rsqrt done once) ----
    count = jnp.float32(M)                   # true (unpadded) element count
    ch_sum = jnp.sum(tile_sum[:, 0, :], axis=0)
    ch_sq = jnp.sum(tile_sq[:, 0, :], axis=0)
    mean = ch_sum / count
    # TODO(synk): E[y^2]-E[y]^2 can cancel for |mean| >> std; switch to a
    # shifted/Welford combine of the per-tile partials if that regime matters.
    var = jnp.maximum(ch_sq / count - mean * mean, 0.0)   # biased var (PyTorch train-mode BN)
    inv = jax.lax.rsqrt(var + eps)
    gamma_p = jnp.pad(gamma.astype(jnp.float32), (0, Cp - Cout))
    beta_p = jnp.pad(beta.astype(jnp.float32), (0, Cp - Cout))
    scale = (gamma_p * inv).reshape(1, Cp)
    shift = (beta_p - mean * gamma_p * inv).reshape(1, Cp)
    # TODO(synk): running_mean / running_var updates are training state only
    # (no effect on the forward output), not emitted here.

    # ---- Pallas kernel 2: tiled normalize + ReLU (y aliased into the output) ----
    out2d = pl.pallas_call(
        _bn_relu_kernel,
        out_shape=jax.ShapeDtypeStruct((M_pad, Cp), jnp.float32),
        grid=(num_m,),
        in_specs=[
            pl.BlockSpec((tile_m, Cp), lambda i: (i, 0)),
            pl.BlockSpec((1, Cp), lambda i: (0, 0)),
            pl.BlockSpec((1, Cp), lambda i: (0, 0)),
        ],
        out_specs=pl.BlockSpec((tile_m, Cp), lambda i: (i, 0)),
        input_output_aliases={0: 0},
        compiler_params=pltpu.CompilerParams(
            dimension_semantics=("parallel",),
            vmem_limit_bytes=_VMEM_LIMIT),
    )(y, scale, shift)

    out = out2d[:M, :Cout].reshape(N, H, W, Cout)
    # NCHW at the module boundary (PyTorch interface).
    # TODO(synk): keep NHWC end-to-end when stacking multiple ConvBNReLU blocks.
    return jnp.transpose(out, (0, 3, 1, 2))


# ------------------------------ pure-JAX reference --------------------------- #

def reference(x_nchw, weight, gamma, beta, eps=1e-5):
    y = jax.lax.conv_general_dilated(
        x_nchw, weight, window_strides=(1, 1), padding=((1, 1), (1, 1)),
        dimension_numbers=("NCHW", "OIHW", "NCHW"),
        precision=jax.lax.Precision.HIGHEST)
    mean = jnp.mean(y, axis=(0, 2, 3), keepdims=True)
    var = jnp.mean(jnp.square(y - mean), axis=(0, 2, 3), keepdims=True)
    yn = (y - mean) * jax.lax.rsqrt(var + eps)
    yn = yn * gamma.reshape(1, -1, 1, 1) + beta.reshape(1, -1, 1, 1)
    return jnp.maximum(yn, 0.0)


if __name__ == "__main__":
    N, Cin, Cout, H, W, K = 2, 4, 8, 16, 16, 3

    key = jax.random.PRNGKey(0)
    kx, kw, kg, kb = jax.random.split(key, 4)
    x = jax.random.normal(kx, (N, Cin, H, W), jnp.float32)
    # Conv2d has bias=False since BN follows (bias='auto').
    weight = 0.1 * jax.random.normal(kw, (Cout, Cin, K, K), jnp.float32)
    gamma = 1.0 + 0.1 * jax.random.normal(kg, (Cout,), jnp.float32)
    beta = 0.1 * jax.random.normal(kb, (Cout,), jnp.float32)

    fn = jax.jit(conv_bn_relu)
    out = jax.block_until_ready(fn(x, weight, gamma, beta))

    ref = reference(x, weight, gamma, beta)
    assert out.shape == (N, Cout, H, W), out.shape
    max_err = float(jnp.max(jnp.abs(out - ref)))
    # bf16 MXU operands -> ~1e-2-scale absolute error after BN normalization.
    assert jnp.allclose(out, ref, atol=2e-2, rtol=2e-2), f"max_err={max_err}"
    print("KERNEL_OK")
</pallas_src>

<mosaic_0001>
module attributes {stable_mosaic.version = 11 : i64} {
  func.func @_conv_stats_kernel(%arg0: i32, %arg1: i32, %arg2: memref<256x36xbf16, #tpu.memory_space<vmem>>, %arg3: memref<36x128xbf16, #tpu.memory_space<vmem>>, %arg4: memref<256x128xf32, #tpu.memory_space<vmem>>, %arg5: memref<1x1x128xf32, #tpu.memory_space<vmem>>, %arg6: memref<1x1x128xf32, #tpu.memory_space<vmem>>, %arg7: memref<256x128xf32, #tpu.memory_space<vmem>>) attributes {dimension_semantics = [#tpu.dimension_semantics<parallel>, #tpu.dimension_semantics<arbitrary>], iteration_bounds = array<i64: 2, 1>, scalar_prefetch = 0 : i64, scratch_operands = 1 : i64, tpu.core_type = #tpu.core_type<tc>, window_params = [{transform_indices = @transform_0, window_bounds = array<i64: 256, 36>}, {transform_indices = @transform_1, window_bounds = array<i64: 36, 128>}, {transform_indices = @transform_2, window_bounds = array<i64: 256, 128>}, {transform_indices = @transform_3, window_bounds = array<i64: 1, 1, 128>}, {transform_indices = @transform_4, window_bounds = array<i64: 1, 1, 128>}]} {
    %c0_i32 = arith.constant 0 : i32
    %0 = arith.cmpi eq, %arg1, %c0_i32 : i32
    %1 = arith.extui %0 : i1 to i32
    %c0_i32_0 = arith.constant 0 : i32
    %2 = arith.cmpi ne, %1, %c0_i32_0 : i32
    scf.if %2 {
      %cst_10 = arith.constant 0.000000e+00 : f32
      %12 = vector.broadcast %cst_10 : f32 to vector<256x128xf32>
      %c0_11 = arith.constant 0 : index
      %c0_12 = arith.constant 0 : index
      %13 = vector.load %arg7[%c0_11, %c0_12] : memref<256x128xf32, #tpu.memory_space<vmem>>, vector<256x128xf32>
      tpu.vector_store %arg7[%c0_11, %c0_12], %12 {strides = array<i32>} : memref<256x128xf32, #tpu.memory_space<vmem>>, vector<256x128xf32>,
    } else {
    }
    %c0 = arith.constant 0 : index
    %c0_1 = arith.constant 0 : index
    %3 = vector.load %arg7[%c0, %c0_1] : memref<256x128xf32, #tpu.memory_space<vmem>>, vector<256x128xf32>
    %c0_2 = arith.constant 0 : index
    %c0_3 = arith.constant 0 : index
    %4 = vector.load %arg2[%c0_2, %c0_3] : memref<256x36xbf16, #tpu.memory_space<vmem>>, vector<256x36xbf16>
    %c0_4 = arith.constant 0 : index
    %c0_5 = arith.constant 0 : index
    %5 = vector.load %arg3[%c0_4, %c0_5] : memref<36x128xbf16, #tpu.memory_space<vmem>>, vector<36x128xbf16>
    %cst = arith.constant dense<0.000000e+00> : vector<256x128xf32>
    %6 = tpu.matmul %4, %5, %cst {dimension_numbers = #tpu.dot_dimension_numbers<[1], [0], [0], [1], [0, 0, 1, 1], [], []>} : vector<256x36xbf16>, vector<36x128xbf16>, vector<256x128xf32> -> vector<256x128xf32>
    %7 = arith.addf %3, %6 : vector<256x128xf32>
    %c0_6 = arith.constant 0 : index
    %c0_7 = arith.constant 0 : index
    %8 = vector.load %arg7[%c0_6, %c0_7] : memref<256x128xf32, #tpu.memory_space<vmem>>, vector<256x128xf32>
    tpu.vector_store %arg7[%c0_6, %c0_7], %7 {strides = array<i32>} : memref<256x128xf32, #tpu.memory_space<vmem>>, vector<256x128xf32>,
    %c0_i32_8 = arith.constant 0 : i32
    %9 = arith.cmpi eq, %arg1, %c0_i32_8 : i32
    %10 = arith.extui %9 : i1 to i32
    %c0_i32_9 = arith.constant 0 : i32
    %11 = arith.cmpi ne, %10, %c0_i32_9 : i32
    scf.if %11 {
      %c0_10 = arith.constant 0 : index
      %c0_11 = arith.constant 0 : index
      %12 = vector.load %arg7[%c0_10, %c0_11] : memref<256x128xf32, #tpu.memory_space<vmem>>, vector<256x128xf32>
      %c0_12 = arith.constant 0 : index
      %c0_13 = arith.constant 0 : index
      %13 = vector.load %arg4[%c0_12, %c0_13] : memref<256x128xf32, #tpu.memory_space<vmem>>, vector<256x128xf32>
      tpu.vector_store %arg4[%c0_12, %c0_13], %12 {strides = array<i32>} : memref<256x128xf32, #tpu.memory_space<vmem>>, vector<256x128xf32>,
      %cst_14 = arith.constant dense<0.000000e+00> : vector<128xf32>
      %14 = vector.multi_reduction <add>, %12, %cst_14 [0] : vector<256x128xf32> to vector<128xf32>
      %15 = vector.shape_cast %14 : vector<128xf32> to vector<1x128xf32>
      %16 = vector.shape_cast %15 : vector<1x128xf32> to vector<1x1x128xf32>
      %c0_15 = arith.constant 0 : index
      %c0_16 = arith.constant 0 : index
      %c0_17 = arith.constant 0 : index
      %17 = vector.load %arg5[%c0_15, %c0_16, %c0_17] : memref<1x1x128xf32, #tpu.memory_space<vmem>>, vector<1x1x128xf32>
      tpu.vector_store %arg5[%c0_15, %c0_16, %c0_17], %16 {strides = array<i32>} : memref<1x1x128xf32, #tpu.memory_space<vmem>>, vector<1x1x128xf32>,
      %18 = arith.mulf %12, %12 : vector<256x128xf32>
      %cst_18 = arith.constant dense<0.000000e+00> : vector<128xf32>
      %19 = vector.multi_reduction <add>, %18, %cst_18 [0] : vector<256x128xf32> to vector<128xf32>
      %20 = vector.shape_cast %19 : vector<128xf32> to vector<1x128xf32>
      %21 = vector.shape_cast %20 : vector<1x128xf32> to vector<1x1x128xf32>
      %c0_19 = arith.constant 0 : index
      %c0_20 = arith.constant 0 : index
      %c0_21 = arith.constant 0 : index
      %22 = vector.load %arg6[%c0_19, %c0_20, %c0_21] : memref<1x1x128xf32, #tpu.memory_space<vmem>>, vector<1x1x128xf32>
      tpu.vector_store %arg6[%c0_19, %c0_20, %c0_21], %21 {strides = array<i32>} : memref<1x1x128xf32, #tpu.memory_space<vmem>>, vector<1x1x128xf32>,
    } else {
    }
    return
  }
  func.func @transform_0(%arg0: i32, %arg1: i32) -> (i32, i32) {
    %c0_i32 = arith.constant 0 : i32
    return %arg0, %arg1 : i32, i32
  }
  func.func @transform_1(%arg0: i32, %arg1: i32) -> (i32, i32) {
    %c0_i32 = arith.constant 0 : i32
    %c0_i32_0 = arith.constant 0 : i32
    return %arg1, %c0_i32 : i32, i32
  }
  func.func @transform_2(%arg0: i32, %arg1: i32) -> (i32, i32) {
    %c0_i32 = arith.constant 0 : i32
    %c0_i32_0 = arith.constant 0 : i32
    return %arg0, %c0_i32 : i32, i32
  }
  func.func @transform_3(%arg0: i32, %arg1: i32) -> (i32, i32, i32) {
    %c0_i32 = arith.constant 0 : i32
    %c0_i32_0 = arith.constant 0 : i32
    %c0_i32_1 = arith.constant 0 : i32
    return %arg0, %c0_i32, %c0_i32_0 : i32, i32, i32
  }
  func.func @transform_4(%arg0: i32, %arg1: i32) -> (i32, i32, i32) {
    %c0_i32 = arith.constant 0 : i32
    %c0_i32_0 = arith.constant 0 : i32
    %c0_i32_1 = arith.constant 0 : i32
    return %arg0, %c0_i32, %c0_i32_0 : i32, i32, i32
  }
}

module attributes {stable_mosaic.version = 11 : i64} {
  func.func @_bn_relu_kernel(%arg0: i32, %arg1: memref<256x128xf32, #tpu.memory_space<vmem>>, %arg2: memref<1x128xf32, #tpu.memory_space<vmem>>, %arg3: memref<1x128xf32, #tpu.memory_space<vmem>>, %arg4: memref<256x128xf32, #tpu.memory_space<vmem>>) attributes {dimension_semantics = [#tpu.dimension_semantics<parallel>], iteration_bounds = array<i64: 2>, scalar_prefetch = 0 : i64, scratch_operands = 0 : i64, tpu.core_type = #tpu.core_type<tc>, window_params = [{transform_indices = @transform_0, window_bounds = array<i64: 256, 128>}, {pipeline_mode = #tpu.pipeline_mode<synchronous>, transform_indices = @transform_1, window_bounds = array<i64: 1, 128>}, {pipeline_mode = #tpu.pipeline_mode<synchronous>, transform_indices = @transform_2, window_bounds = array<i64: 1, 128>}, {transform_indices = @transform_3, window_bounds = array<i64: 256, 128>}]} {
    %c0 = arith.constant 0 : index
    %c0_0 = arith.constant 0 : index
    %0 = vector.load %arg1[%c0, %c0_0] : memref<256x128xf32, #tpu.memory_space<vmem>>, vector<256x128xf32>
    %c0_1 = arith.constant 0 : index
    %c0_2 = arith.constant 0 : index
    %1 = vector.load %arg2[%c0_1, %c0_2] : memref<1x128xf32, #tpu.memory_space<vmem>>, vector<1x128xf32>
    %2 = vector.broadcast %1 : vector<1x128xf32> to vector<256x128xf32>
    %3 = arith.mulf %0, %2 : vector<256x128xf32>
    %c0_3 = arith.constant 0 : index
    %c0_4 = arith.constant 0 : index
    %4 = vector.load %arg3[%c0_3, %c0_4] : memref<1x128xf32, #tpu.memory_space<vmem>>, vector<1x128xf32>
    %5 = vector.broadcast %4 : vector<1x128xf32> to vector<256x128xf32>
    %6 = arith.addf %3, %5 : vector<256x128xf32>
    %cst = arith.constant 0.000000e+00 : f32
    %7 = vector.broadcast %cst : f32 to vector<256x128xf32>
    %8 = arith.maximumf %6, %7 : vector<256x128xf32>
    %c0_5 = arith.constant 0 : index
    %c0_6 = arith.constant 0 : index
    %9 = vector.load %arg4[%c0_5, %c0_6] : memref<256x128xf32, #tpu.memory_space<vmem>>, vector<256x128xf32>
    tpu.vector_store %arg4[%c0_5, %c0_6], %8 {strides = array<i32>} : memref<256x128xf32, #tpu.memory_space<vmem>>, vector<256x128xf32>,
    return
  }
  func.func @transform_0(%arg0: i32) -> (i32, i32) {
    %c0_i32 = arith.constant 0 : i32
    %c0_i32_0 = arith.constant 0 : i32
    return %arg0, %c0_i32 : i32, i32
  }
  func.func @transform_1(%arg0: i32) -> (i32, i32) {
    %c0_i32 = arith.constant 0 : i32
    %c0_i32_0 = arith.constant 0 : i32
    %c0_i32_1 = arith.constant 0 : i32
    return %c0_i32, %c0_i32_0 : i32, i32
  }
  func.func @transform_2(%arg0: i32) -> (i32, i32) {
    %c0_i32 = arith.constant 0 : i32
    %c0_i32_0 = arith.constant 0 : i32
    %c0_i32_1 = arith.constant 0 : i32
    return %c0_i32, %c0_i32_0 : i32, i32
  }
  func.func @transform_3(%arg0: i32) -> (i32, i32) {
    %c0_i32 = arith.constant 0 : i32
    %c0_i32_0 = arith.constant 0 : i32
    return %arg0, %c0_i32 : i32, i32
  }
}

</mosaic_0001>

<bundles_post_ra>
// kernel: conv_bn_relu.3
= control target key start
LH: loop header
LB: loop body
LE: loop exit
PB: predicated region body
PF: predicated region fallthrough
CT: control target
= control target key end

     0   :  { %s453_s12 = smov 0   ;;  %s643_s0 = inlined_call_operand.vmem [shape: f32[512,128], index: 0, kind: input, shape index: {}, may-alias: {0,3}]   ;;  %s644_s1 = inlined_call_operand.vmem [shape: f32[1,128], index: 1, kind: input, shape index: {}]   ;;  %s645_s2 = inlined_call_operand.vmem [shape: f32[1,128], index: 2, kind: input, shape index: {}]   ;;  %s646_s3 = inlined_call_operand.vmem [shape: f32[512,128], index: 3, kind: output, shape index: {}, may-alias: {0,3}]  }
   0x1 LB: > { %s404_s13 = sadd.s32 4294967295, %s431_s12   ;;  %p408_p0 = scmp.ge.s32.totalorder %s431_s12, 1  ;;  %s431_s12 = sphi %s453_s12, %s13_s12  }
   0x2   : > { %p138_p1 = scmp.lt.s32.totalorder %s431_s12, 3 }
   0x4   : > { %p139_p2 = pnand %p408_p0, %p138_p1 }
   0x5   : > { %s409_s14 = sshll.u32 (!%p139_p2), %s404_s13, 5  ;;  %v467_v0 = vld [vmem:[%s644_s1] ss:$0 sm:$0xff] (!%p139_p2) }
   0x6   : > { %142 = sbr.rel (%p139_p2) target bundleno = 46 (0x2e), region = 32  ;;  %p163_p3 = scmp.lt.s32.totalorder (!%p139_p2), %s409_s14, 63  ;;  %v479_v1 = vld [vmem:[%s645_s2] ss:$0 sm:$0xff] (!%p139_p2) }
   0xd   : > { %s648_s14 = smov (!%p163_p3, %s409_s14), 63 }
   0xe   : > { %s410_s15 = sshll.u32 %s648_s14, 3 }
   0xf   : > { %s474_s20 = scalar_lea.vmem %s643_s0, %s410_s15  ;;  %s521_s25 = scalar_lea.vmem %s646_s3, %s410_s15 }
  0x10   : > { %v174_v2 = vld [vmem:[%s474_s20] sm:$0xff]  ;;  %v175_v3 = vld [vmem:[%s474_s20 + $0x8] sm:$0xff]  ;;  %v176_v4 = vld [vmem:[%s474_s20 + $0x10] sm:$0xff] }
  0x11   : > { %v177_v5 = vld [vmem:[%s474_s20 + $0x18] sm:$0xff]  ;;  %v178_v6 = vld [vmem:[%s474_s20 + $0x20] sm:$0xff]  ;;  %v179_v7 = vld [vmem:[%s474_s20 + $0x28] sm:$0xff]  ;;  %v213_v8 = vmul.f32 %v467_v0, %v174_v2  ;;  %v214_v9 = vmul.f32 %v467_v0, %v175_v3  ;;  %v215_v10 = vmul.f32 %v467_v0, %v176_v4 }
  0x12   : > { %v180_v11 = vld [vmem:[%s474_s20 + $0x30] sm:$0xff]  ;;  %v181_v12 = vld [vmem:[%s474_s20 + $0x38] sm:$0xff]  ;;  %v216_v13 = vmul.f32 %v467_v0, %v177_v5  ;;  %v217_v14 = vmul.f32 %v467_v0, %v178_v6  ;;  %v218_v15 = vmul.f32 %v467_v0, %v179_v7  ;;  %v182_v20 = vld [vmem:[%s474_s20 + $0x40] sm:$0xff] }
  0x13   : > { %v252_v16 = vadd.f32 %v479_v1, %v213_v8  ;;  %v253_v17 = vadd.f32 %v479_v1, %v214_v9  ;;  %v254_v18 = vadd.f32 %v479_v1, %v215_v10  ;;  %v219_v19 = vmul.f32 %v467_v0, %v180_v11  ;;  %v183_v21 = vld [vmem:[%s474_s20 + $0x48] sm:$0xff]  ;;  %v184_v22 = vld [vmem:[%s474_s20 + $0x50] sm:$0xff]  ;;  %v185_v27 = vld [vmem:[%s474_s20 + $0x58] sm:$0xff] }
  0x14   : > { %v255_v23 = vadd.f32 %v479_v1, %v216_v13  ;;  %v256_v24 = vadd.f32 %v479_v1, %v217_v14  ;;  %v257_v25 = vadd.f32 %v479_v1, %v218_v15  ;;  %v220_v26 = vmul.f32 %v467_v0, %v181_v12  ;;  %v186_v28 = vld [vmem:[%s474_s20 + $0x60] sm:$0xff]  ;;  %v187_v29 = vld [vmem:[%s474_s20 + $0x68] sm:$0xff]  ;;  %v188_v34 = vld [vmem:[%s474_s20 + $0x70] sm:$0xff] }
  0x15   : > { %v284_v30 = vmax.f32 %v252_v16, 0.0  ;;  %v285_v31 = vmax.f32 %v253_v17, 0.0  ;;  %v286_v32 = vmax.f32 %v254_v18, 0.0  ;;  %v258_v33 = vadd.f32 %v479_v1, %v219_v19  ;;  %v189_v39 = vld [vmem:[%s474_s20 + $0x78] sm:$0xff]  ;;  %v190_v44 = vld [vmem:[%s474_s20 + $0x80] sm:$0xff]  ;;  %v191_v45 = vld [vmem:[%s474_s20 + $0x88] sm:$0xff] }
  0x16   : > { %v287_v35 = vmax.f32 %v255_v23, 0.0  ;;  %v288_v36 = vmax.f32 %v256_v24, 0.0  ;;  %v289_v37 = vmax.f32 %v257_v25, 0.0  ;;  %v259_v38 = vadd.f32 %v479_v1, %v220_v26  ;;  %v192_v46 = vld [vmem:[%s474_s20 + $0x90] sm:$0xff]  ;;  %v193_v47 = vld [vmem:[%s474_s20 + $0x98] sm:$0xff]  ;;  %v194_v48 = vld [vmem:[%s474_s20 + $0xa0] sm:$0xff] }
  0x17   : > { %v290_v40 = vmax.f32 %v258_v33, 0.0  ;;  %v221_v41 = vmul.f32 %v467_v0, %v182_v20  ;;  %v222_v42 = vmul.f32 %v467_v0, %v183_v21  ;;  %v223_v43 = vmul.f32 %v467_v0, %v184_v22  ;;  %v195_v49 = vld [vmem:[%s474_s20 + $0xa8] sm:$0xff]  ;;  %v196_v50 = vld [vmem:[%s474_s20 + $0xb0] sm:$0xff]  ;;  %v197_v51 = vld [vmem:[%s474_s20 + $0xb8] sm:$0xff] }
  0x18   : > { %v532_v52 = vld [vmem:[%s474_s20 + $0xc0] sm:$0xff]  ;;  %v535_v53 = vld [vmem:[%s474_s20 + $0xc8] sm:$0xff]  ;;  %v291_v54 = vmax.f32 %v259_v38, 0.0  ;;  %v224_v55 = vmul.f32 %v467_v0, %v185_v27  ;;  %v225_v56 = vmul.f32 %v467_v0, %v186_v28  ;;  %v226_v57 = vmul.f32 %v467_v0, %v187_v29  ;;  %v541_v58 = vld [vmem:[%s474_s20 + $0xd0] sm:$0xff] }
  0x19   : > { %v544_v59 = vld [vmem:[%s474_s20 + $0xd8] sm:$0xff]  ;;  %v547_v60 = vld [vmem:[%s474_s20 + $0xe0] sm:$0xff]  ;;  %v260_v61 = vadd.f32 %v479_v1, %v221_v41  ;;  %v261_v62 = vadd.f32 %v479_v1, %v222_v42  ;;  %v262_v63 = vadd.f32 %v479_v1, %v223_v43  ;;  %v227_v2 = vmul.f32 %v467_v0, %v188_v34  ;;  %v554_v3 = vld [vmem:[%s474_s20 + $0xe8] sm:$0xff] }
  0x1a   : > { %v557_v4 = vld [vmem:[%s474_s20 + $0xf0] sm:$0xff]  ;;  %v560_v5 = vld [vmem:[%s474_s20 + $0xf8] sm:$0xff]  ;;  %v263_v6 = vadd.f32 %v479_v1, %v224_v55  ;;  %v264_v7 = vadd.f32 %v479_v1, %v225_v56  ;;  %v265_v8 = vadd.f32 %v479_v1, %v226_v57  ;;  %v228_v9 = vmul.f32 %v467_v0, %v189_v39 }
  0x1b   : > { %316 = vst [vmem:[%s521_s25] sm:$0xff] %v284_v30  ;;  %317 = vst [vmem:[%s521_s25 + $0x8] sm:$0xff] %v285_v31  ;;  %v292_v10 = vmax.f32 %v260_v61, 0.0  ;;  %v293_v11 = vmax.f32 %v261_v62, 0.0  ;;  %v294_v12 = vmax.f32 %v262_v63, 0.0  ;;  %v266_v13 = vadd.f32 %v479_v1, %v227_v2 }
  0x1c   : > { %318 = vst [vmem:[%s521_s25 + $0x10] sm:$0xff] %v286_v32  ;;  %319 = vst [vmem:[%s521_s25 + $0x18] sm:$0xff] %v287_v35  ;;  %v295_v14 = vmax.f32 %v263_v6, 0.0  ;;  %v296_v15 = vmax.f32 %v264_v7, 0.0  ;;  %v297_v16 = vmax.f32 %v265_v8, 0.0  ;;  %v267_v17 = vadd.f32 %v479_v1, %v228_v9 }
  0x1d   : > { %320 = vst [vmem:[%s521_s25 + $0x20] sm:$0xff] %v288_v36  ;;  %321 = vst [vmem:[%s521_s25 + $0x28] sm:$0xff] %v289_v37  ;;  %v298_v18 = vmax.f32 %v266_v13, 0.0  ;;  %v229_v19 = vmul.f32 %v467_v0, %v190_v44  ;;  %v230_v20 = vmul.f32 %v467_v0, %v191_v45  ;;  %v231_v21 = vmul.f32 %v467_v0, %v192_v46 }
  0x1e   : > { %322 = vst [vmem:[%s521_s25 + $0x30] sm:$0xff] %v290_v40  ;;  %323 = vst [vmem:[%s521_s25 + $0x38] sm:$0xff] %v291_v54  ;;  %v299_v22 = vmax.f32 %v267_v17, 0.0  ;;  %v232_v23 = vmul.f32 %v467_v0, %v193_v47  ;;  %v233_v24 = vmul.f32 %v467_v0, %v194_v48  ;;  %v234_v25 = vmul.f32 %v467_v0, %v195_v49 }
  0x1f   : > { %324 = vst [vmem:[%s521_s25 + $0x40] sm:$0xff] %v292_v10  ;;  %325 = vst [vmem:[%s521_s25 + $0x48] sm:$0xff] %v293_v11  ;;  %v268_v26 = vadd.f32 %v479_v1, %v229_v19  ;;  %v269_v27 = vadd.f32 %v479_v1, %v230_v20  ;;  %v270_v28 = vadd.f32 %v479_v1, %v231_v21 }
  0x20   : > { %326 = vst [vmem:[%s521_s25 + $0x50] sm:$0xff] %v294_v12  ;;  %327 = vst [vmem:[%s521_s25 + $0x58] sm:$0xff] %v295_v14  ;;  %v235_v29 = vmul.f32 %v467_v0, %v196_v50  ;;  %v271_v30 = vadd.f32 %v479_v1, %v232_v23  ;;  %v272_v31 = vadd.f32 %v479_v1, %v233_v24 }
  0x21   : > { %328 = vst [vmem:[%s521_s25 + $0x60] sm:$0xff] %v296_v15  ;;  %329 = vst [vmem:[%s521_s25 + $0x68] sm:$0xff] %v297_v16  ;;  %v273_v32 = vadd.f32 %v479_v1, %v234_v25  ;;  %v236_v33 = vmul.f32 %v467_v0, %v197_v51  ;;  %v300_v34 = vmax.f32 %v268_v26, 0.0  ;;  %v301_v35 = vmax.f32 %v269_v27, 0.0 }
  0x22   : > { %330 = vst [vmem:[%s521_s25 + $0x70] sm:$0xff] %v298_v18  ;;  %331 = vst [vmem:[%s521_s25 + $0x78] sm:$0xff] %v299_v22  ;;  %v302_v36 = vmax.f32 %v270_v28, 0.0  ;;  %v274_v37 = vadd.f32 %v479_v1, %v235_v29  ;;  %v303_v38 = vmax.f32 %v271_v30, 0.0  ;;  %v304_v39 = vmax.f32 %v272_v31, 0.0 }
  0x23   : > { %v305_v40 = vmax.f32 %v273_v32, 0.0  ;;  %v275_v41 = vadd.f32 %v479_v1, %v236_v33  ;;  %332 = vst [vmem:[%s521_s25 + $0x80] sm:$0xff] %v300_v34  ;;  %333 = vst [vmem:[%s521_s25 + $0x88] sm:$0xff] %v301_v35  ;;  %v237_v43 = vmul.f32 %v467_v0, %v532_v52  ;;  %v238_v44 = vmul.f32 %v467_v0, %v535_v53 }
  0x24   : > { %334 = vst [vmem:[%s521_s25 + $0x90] sm:$0xff] %v302_v36  ;;  %v306_v42 = vmax.f32 %v274_v37, 0.0  ;;  %v239_v45 = vmul.f32 %v467_v0, %v541_v58  ;;  %335 = vst [vmem:[%s521_s25 + $0x98] sm:$0xff] %v303_v38  ;;  %v240_v47 = vmul.f32 %v467_v0, %v544_v59  ;;  %v241_v48 = vmul.f32 %v467_v0, %v547_v60 }
  0x25   : > { %336 = vst [vmem:[%s521_s25 + $0xa0] sm:$0xff] %v304_v39  ;;  %337 = vst [vmem:[%s521_s25 + $0xa8] sm:$0xff] %v305_v40  ;;  %v307_v46 = vmax.f32 %v275_v41, 0.0  ;;  %v242_v49 = vmul.f32 %v467_v0, %v554_v3  ;;  %v276_v50 = vadd.f32 %v479_v1, %v237_v43  ;;  %v277_v51 = vadd.f32 %v479_v1, %v238_v44 }
  0x26   : > { %338 = vst [vmem:[%s521_s25 + $0xb0] sm:$0xff] %v306_v42  ;;  %v278_v52 = vadd.f32 %v479_v1, %v239_v45  ;;  %v243_v53 = vmul.f32 %v467_v0, %v557_v4  ;;  %v279_v54 = vadd.f32 %v479_v1, %v240_v47  ;;  %v280_v55 = vadd.f32 %v479_v1, %v241_v48 }
  0x27   : > { %339 = vst [vmem:[%s521_s25 + $0xb8] sm:$0xff] %v307_v46  ;;  %v281_v56 = vadd.f32 %v479_v1, %v242_v49  ;;  %v244_v57 = vmul.f32 %v467_v0, %v560_v5  ;;  %v308_v58 = vmax.f32 %v276_v50, 0.0  ;;  %v309_v59 = vmax.f32 %v277_v51, 0.0 }
  0x28   : > { %v310_v60 = vmax.f32 %v278_v52, 0.0  ;;  %v282_v61 = vadd.f32 %v479_v1, %v243_v53  ;;  %v311_v62 = vmax.f32 %v279_v54, 0.0  ;;  %v312_v63 = vmax.f32 %v280_v55, 0.0 }
  0x29   : > { %v313_v2 = vmax.f32 %v281_v56, 0.0  ;;  %v283_v3 = vadd.f32 %v479_v1, %v244_v57  ;;  %340 = vst [vmem:[%s521_s25 + $0xc0] sm:$0xff] %v308_v58  ;;  %341 = vst [vmem:[%s521_s25 + $0xc8] sm:$0xff] %v309_v59 }
  0x2a   : > { %342 = vst [vmem:[%s521_s25 + $0xd0] sm:$0xff] %v310_v60  ;;  %v314_v4 = vmax.f32 %v282_v61, 0.0  ;;  %343 = vst [vmem:[%s521_s25 + $0xd8] sm:$0xff] %v311_v62 }
  0x2b   : > { %344 = vst [vmem:[%s521_s25 + $0xe0] sm:$0xff] %v312_v63  ;;  %345 = vst [vmem:[%s521_s25 + $0xe8] sm:$0xff] %v313_v2  ;;  %v315_v0 = vmax.f32 %v283_v3, 0.0 }
  0x2c   : > { %346 = vst [vmem:[%s521_s25 + $0xf0] sm:$0xff] %v314_v4 }
  0x2d   : > { %347 = vst [vmem:[%s521_s25 + $0xf8] sm:$0xff] %v315_v0 }
  0x2e PF: > { %s13_s12 = sadd.s32 1, %s431_s12  }
  0x2f   : > { %p10_p4 = scmp.ge.s32.totalorder %s13_s12, 4  }
  0x31   :  { %12 = sbr.rel (!%p10_p4) target bundleno = 1 (0x1), region = 62 }

// kernel: conv_bn_relu.2
= control target key start
LH: loop header
LB: loop body
LE: loop exit
PB: predicated region body
PF: predicated region fallthrough
CT: control target
= control target key end

     0   :  { %s1254_s15 = smov 0   ;;  %s1256_s16 = smov 0   ;;  %s1439_s0 = inlined_call_operand.vmem [shape: bf16[512,36], index: 0, kind: input, shape index: {}]   ;;  %s1440_s1 = inlined_call_operand.vmem [shape: bf16[36,128], index: 1, kind: input, shape index: {}]   ;;  %s1441_s2 = inlined_call_operand.vmem [shape: f32[512,128], index: 2, kind: output, shape index: {0}]   ;;  %s1442_s3 = inlined_call_operand.vmem [shape: f32[2,1,128], index: 3, kind: output, shape index: {1}]   ;;  %s1443_s4 = inlined_call_operand.vmem [shape: f32[2,1,128], index: 4, kind: output, shape index: {2}]  }
   0x1   :  { %s1258_s17 = smov 0  }
   0x2 LB: > { %s27_s18 = sadd.s32 1, %s1223_s16  ;;  %p1055_p0 = scmp.ge.s32.totalorder %s1227_s17, 1  ;;  %s1227_s17 = sphi %s1258_s17, %s15_s17   ;;  %s1223_s16 = sphi %s1256_s16, %s1445_s16   ;;  %s1219_s15 = sphi %s1254_s15, %s1444_s15  }
   0x3   : > { %p29_p1 = scmp.ge.s32.totalorder %s27_s18, 2  ;;  %p196_p2 = scmp.lt.s32.totalorder %s1227_s17, 3 }
   0x5   : > { %s1447_s18 = smov (%p29_p1, %s27_s18), 0  ;;  %p197_p3 = pnand %p1055_p0, %p196_p2 }
   0x6   : > { %v1186_v0 = vld [vmem:[%s1440_s1] sm:$0xff] (!%p197_p3)   ;;  %v1187_v1 = vld [vmem:[%s1440_s1 + $0x8] sm:$0xff] (!%p197_p3)   ;;  %s1056_s23 = sshll.u32 (!%p197_p3), %s1219_s15, 5  ;;  %v1188_v2 = vld [vmem:[%s1440_s1 + $0x10] ss:$0 sps:$4 sm:$0x33] (!%p197_p3)  }
   0x7   : > { %200 = sbr.rel (%p197_p3) target bundleno = 311 (0x137), region = 28  ;;  %1116 = vmatprep.subr.bf16.mxu0 (!%p197_p3), %v1186_v0  ;;  %p237_p4 = scmp.lt.s32.totalorder (!%p197_p3), %s1056_s23, 63  ;;  %1154 = vmatprep.subr.bf16.mxu1 (!%p197_p3), %v1186_v0  ;;  %vm513_vm0 = vcmask (!%p197_p3), 1041408   ;;  %vm464_vm1 = vcmask (!%p197_p3), 293888  }
   0x8   : > { %1117 = vmatpush3.bf16.msra.mxu0 (!%p197_p3), %v1186_v0  ;;  %1157 = vmatpush3.bf16.msra.mxu1 (!%p197_p3), %v1186_v0  ;;  %v515_v3 = vsel (!%p197_p3), %vm513_vm0, %v1188_v2, 0  ;;  %p257_p5 = scmp.lt.s32.totalorder (!%p197_p3), %s1219_s15, 1 }
   0x9   : > { %1118 = vmatprep.subr.bf16.mxu0 (!%p197_p3), %v1187_v1  ;;  %1155 = vmatprep.subr.bf16.mxu1 (!%p197_p3), %v1187_v1 }
   0xc   : > { %1119 = vmatpush3.bf16.msra.mxu0 (!%p197_p3), %v1187_v1  ;;  %1158 = vmatpush3.bf16.msra.mxu1 (!%p197_p3), %v1187_v1 }
   0xd   : > { %1160 = vmatprep.subr.msk.bf16.mxu0 (!%p197_p3), %vm513_vm0, %v1188_v2  ;;  %1161 = vmatprep.subr.msk.bf16.mxu1 (!%p197_p3), %vm513_vm0, %v1188_v2 }
   0xe   : > { %s1449_s23 = smov (!%p237_p4, %s1056_s23), 63  ;;  %s1451_s15 = smov (!%p257_p5, %s1219_s15), 1 }
   0xf   : > { %s1057_s26 = sshll.u32 %s1449_s23, 2  ;;  %s1059_s30 = sshll.u32 %s1449_s23, 3 }
  0x10   : > { %s1290_s29 = scalar_lea.vmem %s1439_s0, %s1057_s26  ;;  %1121 = vmatpush3.bf16.msra.mxu0 %v515_v3  ;;  %1159 = vmatpush3.bf16.msra.mxu1 %v515_v3  ;;  %s1328_s7 = scalar_lea.vmem %s1441_s2, %s1059_s30 }
  0x11   : > { %v1189_v4 = vld [vmem:[%s1290_s29] sm:$0xff]   ;;  %v1190_v5 = vld [vmem:[%s1290_s29 + $0x8] sm:$0xff]   ;;  %v1191_v6 = vld [vmem:[%s1290_s29 + $0x10] sm:$0xff]   ;;  %s259_s10 = scalar_lea.vmem %s1442_s3, %s1451_s15  ;;  %s262_s13 = scalar_lea.vmem %s1443_s4, %s1451_s15 }
  0x12   : > { %1122 = vmatprep.mubr.msk.bf16.mxu0 %vm464_vm1, %v1189_v4  ;;  %v1192_v7 = vld [vmem:[%s1290_s29 + $0x18] sm:$0xff]   ;;  %v1197_v8 = vld [vmem:[%s1290_s29 + $0x40] sm:$0xff]   ;;  %v1198_v9 = vld [vmem:[%s1290_s29 + $0x48] sm:$0xff]  }
  0x13   : > { %1123 = vmatmul.mubr.msk.bf16.vlgmr.msra.gmra.mrb[0].mxu0 %vm464_vm1, %v1190_v5  ;;  %1138 = vmatprep.mubr.msk.bf16.mxu1 %vm464_vm1, %v1197_v8  ;;  %v1199_v10 = vld [vmem:[%s1290_s29 + $0x50] sm:$0xff]   ;;  %v1193_v11 = vld [vmem:[%s1290_s29 + $0x20] sm:$0xff]   ;;  %v1200_v12 = vld [vmem:[%s1290_s29 + $0x58] sm:$0xff]  }
  0x14   : > { %1126 = vmatprep.mubr.msk.bf16.mxu0 %vm464_vm1, %v1191_v6  ;;  %1139 = vmatmul.mubr.msk.bf16.vlgmr.msra.gmra.mrb[0].mxu1 %vm464_vm1, %v1198_v9  ;;  %v1201_v13 = vld [vmem:[%s1290_s29 + $0x60] sm:$0xff]   ;;  %v1194_v14 = vld [vmem:[%s1290_s29 + $0x28] sm:$0xff]   ;;  %v1195_v15 = vld [vmem:[%s1290_s29 + $0x30] sm:$0xff]  }
  0x15   : > { %1142 = vmatprep.mubr.msk.bf16.mxu1 %vm464_vm1, %v1199_v10  ;;  %v1202_v16 = vld [vmem:[%s1290_s29 + $0x68] sm:$0xff]   ;;  %v1203_v17 = vld [vmem:[%s1290_s29 + $0x70] sm:$0xff]   ;;  %v1196_v18 = vld [vmem:[%s1290_s29 + $0x38] sm:$0xff]  }
  0x16   : > { %v1204_v19 = vld [vmem:[%s1290_s29 + $0x78] sm:$0xff]  }
  0x1b   : > { %1127 = vmatmul.mubr.msk.bf16.gmra.mrb[4].mxu0 %vm464_vm1, %v1192_v7 }
  0x1c   : > { %1130 = vmatprep.mubr.msk.bf16.mxu0 %vm464_vm1, %v1193_v11  ;;  %1143 = vmatmul.mubr.msk.bf16.gmra.mrb[4].mxu1 %vm464_vm1, %v1200_v12 }
  0x1d   : > { %1146 = vmatprep.mubr.msk.bf16.mxu1 %vm464_vm1, %v1201_v13 }
  0x23   : > { %1131 = vmatmul.mubr.msk.bf16.gmra.mrb[8].mxu0 %vm464_vm1, %v1194_v14 }
  0x24   : > { %1134 = vmatprep.mubr.msk.bf16.mxu0 %vm464_vm1, %v1195_v15  ;;  %1147 = vmatmul.mubr.msk.bf16.gmra.mrb[8].mxu1 %vm464_vm1, %v1202_v16 }
  0x25   : > { %1150 = vmatprep.mubr.msk.bf16.mxu1 %vm464_vm1, %v1203_v17 }
  0x2b   : > { %1135 = vmatmul.mubr.msk.bf16.gmra.mrb[12].mxu0 %vm464_vm1, %v1196_v18 }
  0x2c   : > { %1151 = vmatmul.mubr.msk.bf16.gmra.mrb[12].mxu1 %vm464_vm1, %v1204_v19 }
  0xe6   : > { %v1124_v20 = vpop.f32.mrb[0].mxu0 }
  0xe7   : > { %779 = vst [vmem:[%s1328_s7 + $0x10] sm:$0xff] %v1124_v20  ;;  %v551_v21 = vpop.f32.mrb[1].mxu0  ;;  %v1334_v27 = vpop.f32.mrb[0].mxu1  ;;  %v849_v28 = vmul.f32 %v1124_v20, %v1124_v20 }
  0xe8   : > { %777 = vst [vmem:[%s1328_s7] sm:$0xff] %v551_v21  ;;  %v1125_v22 = vpop.f32.mrb[2].mxu0  ;;  %v847_v24 = vmul.f32 %v551_v21, %v551_v21  ;;  %795 = vst [vmem:[%s1328_s7 + $0x90] sm:$0xff] %v1334_v27  ;;  %v1338_v31 = vpop.f32.mrb[1].mxu1 }
  0xe9   : > { %780 = vst [vmem:[%s1328_s7 + $0x18] sm:$0xff] %v1125_v22  ;;  %v554_v23 = vpop.f32.mrb[3].mxu0  ;;  %793 = vst [vmem:[%s1328_s7 + $0x80] sm:$0xff] %v1338_v31  ;;  %v1342_v32 = vpop.f32.mrb[2].mxu1  ;;  %v850_v33 = vmul.f32 %v1125_v22, %v1125_v22 }
  0xea   : > { %778 = vst [vmem:[%s1328_s7 + $0x8] sm:$0xff] %v554_v23  ;;  %v809_v25 = vadd.f32 %v554_v23, %v551_v21  ;;  %v848_v26 = vmul.f32 %v554_v23, %v554_v23  ;;  %796 = vst [vmem:[%s1328_s7 + $0x98] sm:$0xff] %v1342_v32  ;;  %v1346_v37 = vpop.f32.mrb[3].mxu1 }
  0xeb   : > { %794 = vst [vmem:[%s1328_s7 + $0x88] sm:$0xff] %v1346_v37 }
  0xec   : > { %v810_v29 = vadd.f32 %v1124_v20, %v809_v25  ;;  %v879_v30 = vadd.f32 %v848_v26, %v847_v24 }
  0xee   : > { %v880_v34 = vadd.f32 %v879_v30, %v849_v28  ;;  %v1128_v35 = vpop.f32.mrb[4].mxu0  ;;  %v811_v36 = vadd.f32 %v1125_v22, %v810_v29 }
  0xef   : > { %783 = vst [vmem:[%s1328_s7 + $0x30] sm:$0xff] %v1128_v35  ;;  %v567_v38 = vpop.f32.mrb[5].mxu0  ;;  %v1354_v47 = vpop.f32.mrb[4].mxu1  ;;  %v853_v48 = vmul.f32 %v1128_v35, %v1128_v35 }
  0xf0   : > { %781 = vst [vmem:[%s1328_s7 + $0x20] sm:$0xff] %v567_v38  ;;  %v812_v39 = vadd.f32 %v811_v36, %v567_v38  ;;  %v851_v40 = vmul.f32 %v567_v38, %v567_v38  ;;  %v881_v41 = vadd.f32 %v880_v34, %v850_v33  ;;  %v1129_v42 = vpop.f32.mrb[6].mxu0  ;;  %799 = vst [vmem:[%s1328_s7 + $0xb0] sm:$0xff] %v1354_v47  ;;  %v1358_v51 = vpop.f32.mrb[5].mxu1 }
  0xf1   : > { %784 = vst [vmem:[%s1328_s7 + $0x38] sm:$0xff] %v1129_v42  ;;  %v570_v43 = vpop.f32.mrb[7].mxu0  ;;  %797 = vst [vmem:[%s1328_s7 + $0xa0] sm:$0xff] %v1358_v51  ;;  %v1362_v52 = vpop.f32.mrb[6].mxu1  ;;  %v854_v53 = vmul.f32 %v1129_v42, %v1129_v42 }
  0xf2   : > { %v882_v44 = vadd.f32 %v881_v41, %v851_v40  ;;  %782 = vst [vmem:[%s1328_s7 + $0x28] sm:$0xff] %v570_v43  ;;  %v813_v45 = vadd.f32 %v812_v39, %v570_v43  ;;  %v852_v46 = vmul.f32 %v570_v43, %v570_v43  ;;  %800 = vst [vmem:[%s1328_s7 + $0xb8] sm:$0xff] %v1362_v52  ;;  %v1366_v57 = vpop.f32.mrb[7].mxu1 }
  0xf3   : > { %798 = vst [vmem:[%s1328_s7 + $0xa8] sm:$0xff] %v1366_v57  ;;  %v865_v43 = vmul.f32 %v1334_v27, %v1334_v27 }
  0xf4   : > { %v814_v49 = vadd.f32 %v1128_v35, %v813_v45  ;;  %v883_v50 = vadd.f32 %v882_v44, %v852_v46  ;;  %v863_v35 = vmul.f32 %v1338_v31, %v1338_v31  ;;  %v866_v46 = vmul.f32 %v1342_v32, %v1342_v32 }
  0xf6   : > { %v884_v54 = vadd.f32 %v883_v50, %v853_v48  ;;  %v1132_v55 = vpop.f32.mrb[8].mxu0  ;;  %v815_v56 = vadd.f32 %v1129_v42, %v814_v49  ;;  %v864_v42 = vmul.f32 %v1346_v37, %v1346_v37 }
  0xf7   : > { %787 = vst [vmem:[%s1328_s7 + $0x50] sm:$0xff] %v1132_v55  ;;  %v583_v58 = vpop.f32.mrb[9].mxu0  ;;  %v1374_v3 = vpop.f32.mrb[8].mxu1  ;;  %v857_v4 = vmul.f32 %v1132_v55, %v1132_v55 }
  0xf8   : > { %785 = vst [vmem:[%s1328_s7 + $0x40] sm:$0xff] %v583_v58  ;;  %v816_v59 = vadd.f32 %v815_v56, %v583_v58  ;;  %v855_v60 = vmul.f32 %v583_v58, %v583_v58  ;;  %v885_v61 = vadd.f32 %v884_v54, %v854_v53  ;;  %v1133_v62 = vpop.f32.mrb[10].mxu0  ;;  %803 = vst [vmem:[%s1328_s7 + $0xd0] sm:$0xff] %v1374_v3  ;;  %v647_v7 = vpop.f32.mrb[9].mxu1 }
  0xf9   : > { %788 = vst [vmem:[%s1328_s7 + $0x58] sm:$0xff] %v1133_v62  ;;  %v586_v63 = vpop.f32.mrb[11].mxu0  ;;  %801 = vst [vmem:[%s1328_s7 + $0xc0] sm:$0xff] %v647_v7  ;;  %v1379_v8 = vpop.f32.mrb[10].mxu1  ;;  %v858_v9 = vmul.f32 %v1133_v62, %v1133_v62 }
  0xfa   : > { %v886_v0 = vadd.f32 %v885_v61, %v855_v60  ;;  %786 = vst [vmem:[%s1328_s7 + $0x48] sm:$0xff] %v586_v63  ;;  %v817_v1 = vadd.f32 %v816_v59, %v586_v63  ;;  %v856_v2 = vmul.f32 %v586_v63, %v586_v63  ;;  %804 = vst [vmem:[%s1328_s7 + $0xd8] sm:$0xff] %v1379_v8  ;;  %v650_v13 = vpop.f32.mrb[11].mxu1 }
  0xfb   : > { %802 = vst [vmem:[%s1328_s7 + $0xc8] sm:$0xff] %v650_v13 }
  0xfc   : > { %v818_v5 = vadd.f32 %v1132_v55, %v817_v1  ;;  %v887_v6 = vadd.f32 %v886_v0, %v856_v2  ;;  %v868_v55 = vmul.f32 %v1366_v57, %v1366_v57  ;;  %v872_v1 = vmul.f32 %v650_v13, %v650_v13 }
  0xfe   : > { %v888_v10 = vadd.f32 %v887_v6, %v857_v4  ;;  %v1136_v11 = vpop.f32.mrb[12].mxu0  ;;  %v819_v12 = vadd.f32 %v1133_v62, %v818_v5 }
  0xff   : > { %791 = vst [vmem:[%s1328_s7 + $0x70] sm:$0xff] %v1136_v11  ;;  %v599_v14 = vpop.f32.mrb[13].mxu0  ;;  %v1152_v23 = vpop.f32.mrb[12].mxu1  ;;  %v861_v24 = vmul.f32 %v1136_v11, %v1136_v11 }
 0x100   : > { %789 = vst [vmem:[%s1328_s7 + $0x60] sm:$0xff] %v599_v14  ;;  %v820_v15 = vadd.f32 %v819_v12, %v599_v14  ;;  %v859_v16 = vmul.f32 %v599_v14, %v599_v14  ;;  %v889_v17 = vadd.f32 %v888_v10, %v858_v9  ;;  %v1137_v18 = vpop.f32.mrb[14].mxu0  ;;  %807 = vst [vmem:[%s1328_s7 + $0xf0] sm:$0xff] %v1152_v23  ;;  %v663_v28 = vpop.f32.mrb[13].mxu1 }
 0x101   : > { %792 = vst [vmem:[%s1328_s7 + $0x78] sm:$0xff] %v1137_v18  ;;  %v602_v19 = vpop.f32.mrb[15].mxu0  ;;  %805 = vst [vmem:[%s1328_s7 + $0xe0] sm:$0xff] %v663_v28  ;;  %v1153_v29 = vpop.f32.mrb[14].mxu1  ;;  %v862_v30 = vmul.f32 %v1137_v18, %v1137_v18 }
 0x102   : > { %v890_v20 = vadd.f32 %v889_v17, %v859_v16  ;;  %790 = vst [vmem:[%s1328_s7 + $0x68] sm:$0xff] %v602_v19  ;;  %v821_v21 = vadd.f32 %v820_v15, %v602_v19  ;;  %v860_v22 = vmul.f32 %v602_v19, %v602_v19  ;;  %808 = vst [vmem:[%s1328_s7 + $0xf8] sm:$0xff] %v1153_v29  ;;  %v666_v36 = vpop.f32.mrb[15].mxu1 }
 0x103   : > { %806 = vst [vmem:[%s1328_s7 + $0xe8] sm:$0xff] %v666_v36  ;;  %v876_v12 = vmul.f32 %v666_v36, %v666_v36  ;;  %v878_v16 = vmul.f32 %v1153_v29, %v1153_v29 }
 0x104   : > { %v822_v25 = vadd.f32 %v1136_v11, %v821_v21  ;;  %v891_v26 = vadd.f32 %v890_v20, %v860_v22 }
 0x106   : > { %v892_v33 = vadd.f32 %v891_v26, %v861_v24  ;;  %v823_v34 = vadd.f32 %v1137_v18, %v822_v25 }
 0x108   : > { %v824_v38 = vadd.f32 %v823_v34, %v1338_v31  ;;  %v893_v39 = vadd.f32 %v892_v33, %v862_v30  ;;  %v867_v31 = vmul.f32 %v1358_v51, %v1358_v51 }
 0x10a   : > { %v894_v40 = vadd.f32 %v893_v39, %v863_v35  ;;  %v825_v41 = vadd.f32 %v824_v38, %v1346_v37 }
 0x10c   : > { %v826_v44 = vadd.f32 %v1334_v27, %v825_v41  ;;  %v895_v45 = vadd.f32 %v894_v40, %v864_v42  ;;  %v869_v27 = vmul.f32 %v1354_v47, %v1354_v47 }
 0x10e   : > { %v896_v48 = vadd.f32 %v895_v45, %v865_v43  ;;  %v827_v49 = vadd.f32 %v1342_v32, %v826_v44  ;;  %v870_v32 = vmul.f32 %v1362_v52, %v1362_v52 }
 0x110   : > { %v828_v50 = vadd.f32 %v827_v49, %v1358_v51  ;;  %v897_v53 = vadd.f32 %v896_v48, %v866_v46  ;;  %v871_v51 = vmul.f32 %v647_v7, %v647_v7 }
 0x112   : > { %v898_v54 = vadd.f32 %v897_v53, %v867_v31  ;;  %v829_v37 = vadd.f32 %v828_v50, %v1366_v57  ;;  %v873_v57 = vmul.f32 %v1374_v3, %v1374_v3 }
 0x114   : > { %v830_v56 = vadd.f32 %v1354_v47, %v829_v37  ;;  %v899_v58 = vadd.f32 %v898_v54, %v868_v55  ;;  %v874_v47 = vmul.f32 %v1379_v8, %v1379_v8 }
 0x116   : > { %v900_v59 = vadd.f32 %v899_v58, %v869_v27  ;;  %v831_v60 = vadd.f32 %v1362_v52, %v830_v56  ;;  %v875_v52 = vmul.f32 %v663_v28, %v663_v28 }
 0x118   : > { %v832_v61 = vadd.f32 %v831_v60, %v647_v7  ;;  %v901_v62 = vadd.f32 %v900_v59, %v870_v32 }
 0x11a   : > { %v902_v63 = vadd.f32 %v901_v62, %v871_v51  ;;  %v833_v0 = vadd.f32 %v832_v61, %v650_v13  ;;  %v877_v13 = vmul.f32 %v1152_v23, %v1152_v23 }
 0x11c   : > { %v834_v2 = vadd.f32 %v1374_v3, %v833_v0  ;;  %v903_v4 = vadd.f32 %v902_v63, %v872_v1 }
 0x11e   : > { %v904_v5 = vadd.f32 %v903_v4, %v873_v57  ;;  %v835_v6 = vadd.f32 %v1379_v8, %v834_v2 }
 0x120   : > { %v836_v9 = vadd.f32 %v835_v6, %v663_v28  ;;  %v905_v7 = vadd.f32 %v904_v5, %v874_v47 }
 0x122   : > { %v906_v10 = vadd.f32 %v905_v7, %v875_v52  ;;  %v837_v11 = vadd.f32 %v836_v9, %v666_v36 }
 0x124   : > { %v838_v14 = vadd.f32 %v1152_v23, %v837_v11  ;;  %v907_v15 = vadd.f32 %v906_v10, %v876_v12 }
 0x126   : > { %v839_v3 = vadd.f32 %v1153_v29, %v838_v14  ;;  %v908_v17 = vadd.f32 %v907_v15, %v877_v13 }
 0x128   : > { %v840_v18 = vrot.slane %v839_v3, 4  ;;  %v909_v19 = vadd.f32 %v908_v17, %v878_v16 }
 0x12a   : > { %v841_v20 = vadd.f32 %v840_v18, %v839_v3  ;;  %v910_v21 = vrot.slane %v909_v19, 4 }
 0x12c   : > { %v842_v22 = vrot.slane %v841_v20, 2  ;;  %v911_v8 = vadd.f32 %v910_v21, %v909_v19 }
 0x12e   : > { %v843_v24 = vadd.f32 %v842_v22, %v841_v20  ;;  %v912_v25 = vrot.slane %v911_v8, 2 }
 0x130   : > { %v844_v26 = vrot.slane %v843_v24, 1  ;;  %v913_v28 = vadd.f32 %v912_v25, %v911_v8 }
 0x132   : > { %v845_v23 = vadd.f32 %v844_v26, %v843_v24  ;;  %v914_v30 = vrot.slane %v913_v28, 1 }
 0x134   : > { %846 = vst [vmem:[%s259_s10] sm:$0x1] %v845_v23  ;;  %v915_v29 = vadd.f32 %v914_v30, %v913_v28 }
 0x136   : > { %916 = vst [vmem:[%s262_s13] sm:$0x1] %v915_v29 }
 0x137 PF: > { %s15_s17 = sadd.s32 1, %s1227_s17   ;;  %s1444_s15 = smov %s1223_s16 }
 0x138   : > { %p12_p6 = scmp.ge.s32.totalorder %s15_s17, 4   ;;  %s1445_s16 = smov %s1447_s18 }
 0x13a   :  { %14 = sbr.rel (!%p12_p6) target bundleno = 2 (0x2), region = 93 }

</bundles_post_ra>
